<compile_context>
chip_gen: v7x
topology: tpu7x:2x2x1
jax: 0.10.0
libtpu: 0.0.40
codegen_flags: <defaults>
</compile_context>

<pallas_src>
import functools

import jax
import jax.numpy as jnp
from jax.experimental import pallas as pl
from jax.experimental.pallas import tpu as pltpu

_SMOOTH = 1e-05


def _dice_partial_kernel(score_ref, target_ref, out_ref,
                         inter_acc, z_acc, y_acc,
                         *, apply_softmax, needs_mask, n_valid):
    """Accumulates per-class (intersect, z_sum, y_sum) for one batch element.

    score_ref : (C, S, 128) scores (input dtype) for one batch / pixel tile
    target_ref: (S, 128)    int32 labels (class i encoded as label i + 1,
                            matching this train.py's _one_hot_encoder)
    out_ref   : (C, 3)      f32 per-batch partial sums [intersect, z, y]
    *_acc     : (C, 128)    f32 running per-class row sums (VMEM scratch)
    """
    t = pl.program_id(1)
    num_t = pl.num_programs(1)

    @pl.when(t == 0)
    def _init():
        inter_acc[...] = jnp.zeros_like(inter_acc)
        z_acc[...] = jnp.zeros_like(z_acc)
        y_acc[...] = jnp.zeros_like(y_acc)

    C, S, L = score_ref.shape
    s = score_ref[...].astype(jnp.float32)          # (C, S, 128)
    tgt = target_ref[...]                           # (S, 128) int32

    if apply_softmax:
        # Per-pixel softmax over the (leading) class axis: elementwise across
        # the C slabs, exp / reciprocal run on the EUP slot.
        m = jnp.max(s, axis=0, keepdims=True)
        e = jnp.exp(s - m)
        denom = jnp.sum(e, axis=0, keepdims=True)
        s = e * pl.reciprocal(denom, approx=True)

    if needs_mask:
        # Only reached when HW % 128 != 0 AND softmax is on: wrapper-padded
        # pixels would otherwise contribute softmax(0) to z_sum.  Padded
        # targets are 0, so intersect / y_sum are already safe.
        sub = jax.lax.broadcasted_iota(jnp.int32, (S, L), 0)
        lane = jax.lax.broadcasted_iota(jnp.int32, (S, L), 1)
        gidx = (t * S + sub) * L + lane
        s = jnp.where((gidx < n_valid)[None, :, :], s, 0.0)

    # Sublane-axis reductions: offload the big adds to the idle MXU when the
    # tile shape is MXU-friendly; otherwise fall back to a plain VALU sum.
    use_mxu = (S % 8 == 0) and (S >= 8)
    if use_mxu:
        ones_rows = jnp.ones((8, S), jnp.float32)

        def _rowsum(x):                      # (S, 128) -> (1, 128)
            r = jnp.dot(ones_rows, x, preferred_element_type=jnp.float32)
            return r[0:1, :]
    else:
        def _rowsum(x):
            return jnp.sum(x, axis=0, keepdims=True)

    inter_rows, z_rows, y_rows = [], [], []
    for c in range(C):                       # static, small
        s_c = s[c]                           # (S, 128)
        onehot_c = (tgt == (c + 1)).astype(jnp.float32)
        inter_rows.append(_rowsum(s_c * onehot_c))
        z_rows.append(_rowsum(s_c * s_c))
        y_rows.append(_rowsum(onehot_c))
    inter_acc[...] += jnp.concatenate(inter_rows, axis=0)
    z_acc[...] += jnp.concatenate(z_rows, axis=0)
    y_acc[...] += jnp.concatenate(y_rows, axis=0)

    @pl.when(t == num_t - 1)
    def _finalize():
        i_col = jnp.sum(inter_acc[...], axis=1, keepdims=True)   # (C, 1)
        z_col = jnp.sum(z_acc[...], axis=1, keepdims=True)
        y_col = jnp.sum(y_acc[...], axis=1, keepdims=True)
        out_ref[...] = jnp.concatenate([i_col, z_col, y_col], axis=1)


def _vmem_capacity_bytes():
    try:
        info = pltpu.get_tpu_info()
        v = getattr(info, "vmem_capacity_bytes", None)
        if v:
            return int(v)
    except Exception:
        pass
    return 64 << 20          # conservative fallback (v7x per-TC physical VMEM)


def _pick_tile_sgroups(hw_groups, c, itemsize, usable_vmem):
    """Number of (8x)128-lane pixel groups per tile (exact divisor, no tail)."""
    # ~2 MiB score block target (sweepable), bounded so double-buffered inputs
    # plus f32 in-kernel temporaries stay well inside usable VMEM.
    blk_budget = max(512 << 10, min(2 << 20, usable_vmem // 12))
    cap = max(1, blk_budget // max(1, c * 128 * itemsize))
    cap = min(cap, hw_groups)
    # TODO(synk): for prime-ish hw_groups this can pick a small divisor; pad to
    # a friendlier multiple in that case.
    for d in range(cap, 0, -1):
        if hw_groups % d == 0:
            return d
    return 1


def dice_loss(inputs, target, n_classes, weight=None, softmax=False):
    """Forward pass of DiceLoss.

    inputs : (N, C, H, W) scores (softmax over C fused in-kernel if softmax)
    target : (N, H, W)    integer labels, class i encoded as label i + 1
    weight : optional length-C per-class weights
    """
    if weight is None:
        weight = jnp.ones((n_classes,), jnp.float32)
    else:
        weight = jnp.asarray(weight, jnp.float32).reshape((n_classes,))
    return _dice_loss_impl(inputs, target, weight, n_classes, bool(softmax))


@functools.partial(jax.jit, static_argnames=("n_classes", "softmax"))
def _dice_loss_impl(inputs, target, weight, n_classes, softmax):
    N, C, H, W = inputs.shape
    assert C == n_classes
    HW = H * W

    score = inputs.reshape(N, C, HW)
    tgt = target.reshape(N, HW).astype(jnp.int32)

    # Pad the pixel axis to a lane multiple (rare; typical segmentation shapes
    # already satisfy HW % 128 == 0, making everything below a free view).
    HWp = ((HW + 127) // 128) * 128
    if HWp != HW:
        pad = HWp - HW
        score = jnp.pad(score, ((0, 0), (0, 0), (0, pad)))
        tgt = jnp.pad(tgt, ((0, 0), (0, pad)))       # label 0 matches no class
    hw_groups = HWp // 128

    # Sublane/lane-dense views: pixels fill the (sublane, lane) minor dims.
    score4 = score.reshape(N, C, hw_groups, 128)
    tgt3 = tgt.reshape(N, hw_groups, 128)

    itemsize = jnp.dtype(inputs.dtype).itemsize
    vmem_cap = _vmem_capacity_bytes()
    usable = (vmem_cap * 3) // 4         # ~48 MiB of 64 on v7x, ~96 of 128 on v5e/v6e
    s_tile = _pick_tile_sgroups(hw_groups, C, itemsize, usable)
    num_tiles = hw_groups // s_tile
    grid = (N, num_tiles)

    # Padded pixels only perturb z_sum through the softmax; with softmax off a
    # zero score contributes zero everywhere, so no in-kernel mask is needed.
    needs_mask = softmax and (HWp != HW)

    kernel = functools.partial(
        _dice_partial_kernel,
        apply_softmax=softmax, needs_mask=needs_mask, n_valid=HW)

    cost = pl.CostEstimate(
        flops=12 * N * C * HWp,
        transcendentals=(N * C * HWp) if softmax else 0,
        bytes_accessed=int(score4.size * itemsize + tgt3.size * 4 + N * C * 3 * 4))

    partials = pl.pallas_call(
        kernel,
        out_shape=jax.ShapeDtypeStruct((N, C, 3), jnp.float32),
        grid_spec=pltpu.PrefetchScalarGridSpec(
            num_scalar_prefetch=0,
            grid=grid,
            in_specs=[
                pl.BlockSpec((None, C, s_tile, 128), lambda n, t: (n, 0, t, 0)),
                pl.BlockSpec((None, s_tile, 128), lambda n, t: (n, t, 0)),
            ],
            out_specs=pl.BlockSpec((None, C, 3), lambda n, t: (n, 0, 0)),
            scratch_shapes=[
                pltpu.VMEM((C, 128), jnp.float32),   # intersect row sums
                pltpu.VMEM((C, 128), jnp.float32),   # z_sum row sums
                pltpu.VMEM((C, 128), jnp.float32),   # y_sum row sums
            ]),
        compiler_params=pltpu.CompilerParams(
            # Per-batch partials are independent -> batch axis can be split
            # across TensorCores (v7x); the pixel-tile axis carries the
            # accumulators and stays sequential.
            dimension_semantics=("parallel", "arbitrary"),
            vmem_limit_bytes=int(usable)),
        cost_estimate=cost,
    )(score4, tgt3)

    # Tiny finalize in the wrapper: batch-sum partials, dice formula, weights.
    totals = jnp.sum(partials, axis=0)               # (C, 3)
    intersect = totals[:, 0]
    z_sum = totals[:, 1]
    y_sum = totals[:, 2]
    dice = 1.0 - (2.0 * intersect + _SMOOTH) / (z_sum + y_sum + _SMOOTH)
    return jnp.sum(dice * weight) / n_classes


def _dice_loss_ref(inputs, target, n_classes, weight=None, softmax=False):
    """Pure-JAX reference mirroring the PyTorch module."""
    if softmax:
        inputs = jax.nn.softmax(inputs, axis=1)
    if weight is None:
        weight = [1.0] * n_classes
    loss = 0.0
    for i in range(n_classes):
        score = inputs[:, i].astype(jnp.float32)
        t = (target == i + 1).astype(jnp.float32)
        intersect = jnp.sum(score * t)
        y_sum = jnp.sum(t * t)
        z_sum = jnp.sum(score * score)
        dice = 1.0 - (2.0 * intersect + _SMOOTH) / (z_sum + y_sum + _SMOOTH)
        loss = loss + dice * weight[i]
    return loss / n_classes


def _check(loss, ref, tag):
    loss = float(loss)
    ref = float(ref)
    tol = 2e-3 * max(1.0, abs(ref))                  # approx-reciprocal headroom
    assert abs(loss - ref) <= tol, (tag, loss, ref)


if __name__ == "__main__":
    key = jax.random.PRNGKey(0)
    n_classes = 4
    N = 2

    # Small case matching the module's typical call: logits (N, C, H, W),
    # integer labels in {0, ..., C} with class i encoded as label i + 1.
    H, W = 16, 16
    k1, k2, k3, k4 = jax.random.split(key, 4)
    logits = jax.random.normal(k1, (N, n_classes, H, W), dtype=jnp.float32)
    labels = jax.random.randint(k2, (N, H, W), 0, n_classes + 1, dtype=jnp.int32)
    loss = jax.block_until_ready(dice_loss(logits, labels, n_classes, softmax=True))
    _check(loss, _dice_loss_ref(logits, labels, n_classes, softmax=True), "small")

    # Larger spatial case: exercises the MXU reduction path and class weights.
    H2, W2 = 128, 128
    logits2 = jax.random.normal(k3, (N, n_classes, H2, W2), dtype=jnp.float32)
    labels2 = jax.random.randint(k4, (N, H2, W2), 0, n_classes + 1, dtype=jnp.int32)
    w = [1.0, 2.0, 0.5, 1.5]
    loss2 = jax.block_until_ready(
        dice_loss(logits2, labels2, n_classes, weight=w, softmax=True))
    _check(loss2, _dice_loss_ref(logits2, labels2, n_classes, weight=w, softmax=True),
           "large")

    print("KERNEL_OK")
</pallas_src>

<mosaic_0001>
module attributes {stable_mosaic.version = 11 : i64} {
  func.func @_dice_partial_kernel(%arg0: i32, %arg1: i32, %arg2: memref<1x4x2x128xf32, #tpu.memory_space<vmem>>, %arg3: memref<1x2x128xi32, #tpu.memory_space<vmem>>, %arg4: memref<1x4x3xf32, #tpu.memory_space<vmem>>, %arg5: memref<4x128xf32, #tpu.memory_space<vmem>>, %arg6: memref<4x128xf32, #tpu.memory_space<vmem>>, %arg7: memref<4x128xf32, #tpu.memory_space<vmem>>) attributes {dimension_semantics = [#tpu.dimension_semantics<parallel>, #tpu.dimension_semantics<arbitrary>], iteration_bounds = array<i64: 2, 1>, scalar_prefetch = 0 : i64, scratch_operands = 3 : i64, tpu.core_type = #tpu.core_type<tc>, window_params = [{transform_indices = @transform_0, window_bounds = array<i64: 1, 4, 2, 128>}, {transform_indices = @transform_1, window_bounds = array<i64: 1, 2, 128>}, {transform_indices = @transform_2, window_bounds = array<i64: 1, 4, 3>}]} {
    %c0_i32 = arith.constant 0 : i32
    %0 = arith.cmpi eq, %arg1, %c0_i32 : i32
    %1 = arith.extui %0 : i1 to i32
    %c0_i32_0 = arith.constant 0 : i32
    %2 = arith.cmpi ne, %1, %c0_i32_0 : i32
    scf.if %2 {
      %cst_34 = arith.constant 0.000000e+00 : f32
      %88 = vector.broadcast %cst_34 : f32 to vector<4x128xf32>
      %c0_35 = arith.constant 0 : index
      %c0_36 = arith.constant 0 : index
      %89 = vector.load %arg5[%c0_35, %c0_36] : memref<4x128xf32, #tpu.memory_space<vmem>>, vector<4x128xf32>
      tpu.vector_store %arg5[%c0_35, %c0_36], %88 {strides = array<i32>} : memref<4x128xf32, #tpu.memory_space<vmem>>, vector<4x128xf32>,
      %cst_37 = arith.constant 0.000000e+00 : f32
      %90 = vector.broadcast %cst_37 : f32 to vector<4x128xf32>
      %c0_38 = arith.constant 0 : index
      %c0_39 = arith.constant 0 : index
      %91 = vector.load %arg6[%c0_38, %c0_39] : memref<4x128xf32, #tpu.memory_space<vmem>>, vector<4x128xf32>
      tpu.vector_store %arg6[%c0_38, %c0_39], %90 {strides = array<i32>} : memref<4x128xf32, #tpu.memory_space<vmem>>, vector<4x128xf32>,
      %cst_40 = arith.constant 0.000000e+00 : f32
      %92 = vector.broadcast %cst_40 : f32 to vector<4x128xf32>
      %c0_41 = arith.constant 0 : index
      %c0_42 = arith.constant 0 : index
      %93 = vector.load %arg7[%c0_41, %c0_42] : memref<4x128xf32, #tpu.memory_space<vmem>>, vector<4x128xf32>
      tpu.vector_store %arg7[%c0_41, %c0_42], %92 {strides = array<i32>} : memref<4x128xf32, #tpu.memory_space<vmem>>, vector<4x128xf32>,
    } else {
    }
    %c0 = arith.constant 0 : index
    %c0_1 = arith.constant 0 : index
    %c0_2 = arith.constant 0 : index
    %c0_3 = arith.constant 0 : index
    %3 = vector.load %arg2[%c0, %c0_1, %c0_2, %c0_3] : memref<1x4x2x128xf32, #tpu.memory_space<vmem>>, vector<1x4x2x128xf32>
    %4 = vector.shape_cast %3 : vector<1x4x2x128xf32> to vector<4x2x128xf32>
    %c0_4 = arith.constant 0 : index
    %c0_5 = arith.constant 0 : index
    %c0_6 = arith.constant 0 : index
    %5 = vector.load %arg3[%c0_4, %c0_5, %c0_6] : memref<1x2x128xi32, #tpu.memory_space<vmem>>, vector<1x2x128xi32>
    %6 = vector.shape_cast %5 : vector<1x2x128xi32> to vector<2x128xi32>
    %cst = arith.constant dense<0xFF800000> : vector<2x128xf32>
    %7 = vector.multi_reduction <maximumf>, %4, %cst [0] : vector<4x2x128xf32> to vector<2x128xf32>
    %8 = vector.shape_cast %7 : vector<2x128xf32> to vector<1x2x128xf32>
    %9 = vector.broadcast %8 : vector<1x2x128xf32> to vector<4x2x128xf32>
    %10 = arith.subf %4, %9 : vector<4x2x128xf32>
    %11 = math.exp %10 : vector<4x2x128xf32>
    %cst_7 = arith.constant dense<0.000000e+00> : vector<2x128xf32>
    %12 = vector.multi_reduction <add>, %11, %cst_7 [0] : vector<4x2x128xf32> to vector<2x128xf32>
    %13 = vector.shape_cast %12 : vector<2x128xf32> to vector<1x2x128xf32>
    %14 = tpu.reciprocal %13 {approx = true} : vector<1x2x128xf32> -> vector<1x2x128xf32>
    %15 = vector.broadcast %14 : vector<1x2x128xf32> to vector<4x2x128xf32>
    %16 = arith.mulf %11, %15 : vector<4x2x128xf32>
    %17 = vector.extract_strided_slice %16 {offsets = [0, 0, 0], sizes = [1, 2, 128], strides = [1, 1, 1]} : vector<4x2x128xf32> to vector<1x2x128xf32>
    %18 = vector.shape_cast %17 : vector<1x2x128xf32> to vector<2x128xf32>
    %c1_i32 = arith.constant 1 : i32
    %19 = vector.broadcast %c1_i32 : i32 to vector<2x128xi32>
    %20 = arith.cmpi eq, %6, %19 : vector<2x128xi32>
    %21 = arith.extui %20 : vector<2x128xi1> to vector<2x128xi32>
    %22 = arith.sitofp %21 : vector<2x128xi32> to vector<2x128xf32>
    %23 = arith.mulf %18, %22 : vector<2x128xf32>
    %cst_8 = arith.constant dense<0.000000e+00> : vector<128xf32>
    %24 = vector.multi_reduction <add>, %23, %cst_8 [0] : vector<2x128xf32> to vector<128xf32>
    %25 = vector.shape_cast %24 : vector<128xf32> to vector<1x128xf32>
    %26 = arith.mulf %18, %18 : vector<2x128xf32>
    %cst_9 = arith.constant dense<0.000000e+00> : vector<128xf32>
    %27 = vector.multi_reduction <add>, %26, %cst_9 [0] : vector<2x128xf32> to vector<128xf32>
    %28 = vector.shape_cast %27 : vector<128xf32> to vector<1x128xf32>
    %cst_10 = arith.constant dense<0.000000e+00> : vector<128xf32>
    %29 = vector.multi_reduction <add>, %22, %cst_10 [0] : vector<2x128xf32> to vector<128xf32>
    %30 = vector.shape_cast %29 : vector<128xf32> to vector<1x128xf32>
    %31 = vector.extract_strided_slice %16 {offsets = [1, 0, 0], sizes = [1, 2, 128], strides = [1, 1, 1]} : vector<4x2x128xf32> to vector<1x2x128xf32>
    %32 = vector.shape_cast %31 : vector<1x2x128xf32> to vector<2x128xf32>
    %c2_i32 = arith.constant 2 : i32
    %33 = vector.broadcast %c2_i32 : i32 to vector<2x128xi32>
    %34 = arith.cmpi eq, %6, %33 : vector<2x128xi32>
    %35 = arith.extui %34 : vector<2x128xi1> to vector<2x128xi32>
    %36 = arith.sitofp %35 : vector<2x128xi32> to vector<2x128xf32>
    %37 = arith.mulf %32, %36 : vector<2x128xf32>
    %cst_11 = arith.constant dense<0.000000e+00> : vector<128xf32>
    %38 = vector.multi_reduction <add>, %37, %cst_11 [0] : vector<2x128xf32> to vector<128xf32>
    %39 = vector.shape_cast %38 : vector<128xf32> to vector<1x128xf32>
    %40 = arith.mulf %32, %32 : vector<2x128xf32>
    %cst_12 = arith.constant dense<0.000000e+00> : vector<128xf32>
    %41 = vector.multi_reduction <add>, %40, %cst_12 [0] : vector<2x128xf32> to vector<128xf32>
    %42 = vector.shape_cast %41 : vector<128xf32> to vector<1x128xf32>
    %cst_13 = arith.constant dense<0.000000e+00> : vector<128xf32>
    %43 = vector.multi_reduction <add>, %36, %cst_13 [0] : vector<2x128xf32> to vector<128xf32>
    %44 = vector.shape_cast %43 : vector<128xf32> to vector<1x128xf32>
    %45 = vector.extract_strided_slice %16 {offsets = [2, 0, 0], sizes = [1, 2, 128], strides = [1, 1, 1]} : vector<4x2x128xf32> to vector<1x2x128xf32>
    %46 = vector.shape_cast %45 : vector<1x2x128xf32> to vector<2x128xf32>
    %c3_i32 = arith.constant 3 : i32
    %47 = vector.broadcast %c3_i32 : i32 to vector<2x128xi32>
    %48 = arith.cmpi eq, %6, %47 : vector<2x128xi32>
    %49 = arith.extui %48 : vector<2x128xi1> to vector<2x128xi32>
    %50 = arith.sitofp %49 : vector<2x128xi32> to vector<2x128xf32>
    %51 = arith.mulf %46, %50 : vector<2x128xf32>
    %cst_14 = arith.constant dense<0.000000e+00> : vector<128xf32>
    %52 = vector.multi_reduction <add>, %51, %cst_14 [0] : vector<2x128xf32> to vector<128xf32>
    %53 = vector.shape_cast %52 : vector<128xf32> to vector<1x128xf32>
    %54 = arith.mulf %46, %46 : vector<2x128xf32>
    %cst_15 = arith.constant dense<0.000000e+00> : vector<128xf32>
    %55 = vector.multi_reduction <add>, %54, %cst_15 [0] : vector<2x128xf32> to vector<128xf32>
    %56 = vector.shape_cast %55 : vector<128xf32> to vector<1x128xf32>
    %cst_16 = arith.constant dense<0.000000e+00> : vector<128xf32>
    %57 = vector.multi_reduction <add>, %50, %cst_16 [0] : vector<2x128xf32> to vector<128xf32>
    %58 = vector.shape_cast %57 : vector<128xf32> to vector<1x128xf32>
    %59 = vector.extract_strided_slice %16 {offsets = [3, 0, 0], sizes = [1, 2, 128], strides = [1, 1, 1]} : vector<4x2x128xf32> to vector<1x2x128xf32>
    %60 = vector.shape_cast %59 : vector<1x2x128xf32> to vector<2x128xf32>
    %c4_i32 = arith.constant 4 : i32
    %61 = vector.broadcast %c4_i32 : i32 to vector<2x128xi32>
    %62 = arith.cmpi eq, %6, %61 : vector<2x128xi32>
    %63 = arith.extui %62 : vector<2x128xi1> to vector<2x128xi32>
    %64 = arith.sitofp %63 : vector<2x128xi32> to vector<2x128xf32>
    %65 = arith.mulf %60, %64 : vector<2x128xf32>
    %cst_17 = arith.constant dense<0.000000e+00> : vector<128xf32>
    %66 = vector.multi_reduction <add>, %65, %cst_17 [0] : vector<2x128xf32> to vector<128xf32>
    %67 = vector.shape_cast %66 : vector<128xf32> to vector<1x128xf32>
    %68 = arith.mulf %60, %60 : vector<2x128xf32>
    %cst_18 = arith.constant dense<0.000000e+00> : vector<128xf32>
    %69 = vector.multi_reduction <add>, %68, %cst_18 [0] : vector<2x128xf32> to vector<128xf32>
    %70 = vector.shape_cast %69 : vector<128xf32> to vector<1x128xf32>
    %cst_19 = arith.constant dense<0.000000e+00> : vector<128xf32>
    %71 = vector.multi_reduction <add>, %64, %cst_19 [0] : vector<2x128xf32> to vector<128xf32>
    %72 = vector.shape_cast %71 : vector<128xf32> to vector<1x128xf32>
    %c0_20 = arith.constant 0 : index
    %c0_21 = arith.constant 0 : index
    %73 = vector.load %arg5[%c0_20, %c0_21] : memref<4x128xf32, #tpu.memory_space<vmem>>, vector<4x128xf32>
    %74 = tpu.concatenate %25, %39, %53, %67 in 0 : vector<1x128xf32>, vector<1x128xf32>, vector<1x128xf32>, vector<1x128xf32> -> vector<4x128xf32>
    %75 = arith.addf %73, %74 : vector<4x128xf32>
    %c0_22 = arith.constant 0 : index
    %c0_23 = arith.constant 0 : index
    %76 = vector.load %arg5[%c0_22, %c0_23] : memref<4x128xf32, #tpu.memory_space<vmem>>, vector<4x128xf32>
    tpu.vector_store %arg5[%c0_22, %c0_23], %75 {strides = array<i32>} : memref<4x128xf32, #tpu.memory_space<vmem>>, vector<4x128xf32>,
    %c0_24 = arith.constant 0 : index
    %c0_25 = arith.constant 0 : index
    %77 = vector.load %arg6[%c0_24, %c0_25] : memref<4x128xf32, #tpu.memory_space<vmem>>, vector<4x128xf32>
    %78 = tpu.concatenate %28, %42, %56, %70 in 0 : vector<1x128xf32>, vector<1x128xf32>, vector<1x128xf32>, vector<1x128xf32> -> vector<4x128xf32>
    %79 = arith.addf %77, %78 : vector<4x128xf32>
    %c0_26 = arith.constant 0 : index
    %c0_27 = arith.constant 0 : index
    %80 = vector.load %arg6[%c0_26, %c0_27] : memref<4x128xf32, #tpu.memory_space<vmem>>, vector<4x128xf32>
    tpu.vector_store %arg6[%c0_26, %c0_27], %79 {strides = array<i32>} : memref<4x128xf32, #tpu.memory_space<vmem>>, vector<4x128xf32>,
    %c0_28 = arith.constant 0 : index
    %c0_29 = arith.constant 0 : index
    %81 = vector.load %arg7[%c0_28, %c0_29] : memref<4x128xf32, #tpu.memory_space<vmem>>, vector<4x128xf32>
    %82 = tpu.concatenate %30, %44, %58, %72 in 0 : vector<1x128xf32>, vector<1x128xf32>, vector<1x128xf32>, vector<1x128xf32> -> vector<4x128xf32>
    %83 = arith.addf %81, %82 : vector<4x128xf32>
    %c0_30 = arith.constant 0 : index
    %c0_31 = arith.constant 0 : index
    %84 = vector.load %arg7[%c0_30, %c0_31] : memref<4x128xf32, #tpu.memory_space<vmem>>, vector<4x128xf32>
    tpu.vector_store %arg7[%c0_30, %c0_31], %83 {strides = array<i32>} : memref<4x128xf32, #tpu.memory_space<vmem>>, vector<4x128xf32>,
    %c0_i32_32 = arith.constant 0 : i32
    %85 = arith.cmpi eq, %arg1, %c0_i32_32 : i32
    %86 = arith.extui %85 : i1 to i32
    %c0_i32_33 = arith.constant 0 : i32
    %87 = arith.cmpi ne, %86, %c0_i32_33 : i32
    scf.if %87 {
      %c0_34 = arith.constant 0 : index
      %c0_35 = arith.constant 0 : index
      %88 = vector.load %arg5[%c0_34, %c0_35] : memref<4x128xf32, #tpu.memory_space<vmem>>, vector<4x128xf32>
      %cst_36 = arith.constant dense<0.000000e+00> : vector<4xf32>
      %89 = vector.multi_reduction <add>, %88, %cst_36 [1] : vector<4x128xf32> to vector<4xf32>
      %90 = vector.shape_cast %89 : vector<4xf32> to vector<4x1xf32>
      %c0_37 = arith.constant 0 : index
      %c0_38 = arith.constant 0 : index
      %91 = vector.load %arg6[%c0_37, %c0_38] : memref<4x128xf32, #tpu.memory_space<vmem>>, vector<4x128xf32>
      %cst_39 = arith.constant dense<0.000000e+00> : vector<4xf32>
      %92 = vector.multi_reduction <add>, %91, %cst_39 [1] : vector<4x128xf32> to vector<4xf32>
      %93 = vector.shape_cast %92 : vector<4xf32> to vector<4x1xf32>
      %c0_40 = arith.constant 0 : index
      %c0_41 = arith.constant 0 : index
      %94 = vector.load %arg7[%c0_40, %c0_41] : memref<4x128xf32, #tpu.memory_space<vmem>>, vector<4x128xf32>
      %cst_42 = arith.constant dense<0.000000e+00> : vector<4xf32>
      %95 = vector.multi_reduction <add>, %94, %cst_42 [1] : vector<4x128xf32> to vector<4xf32>
      %96 = vector.shape_cast %95 : vector<4xf32> to vector<4x1xf32>
      %97 = tpu.concatenate %90, %93, %96 in 1 : vector<4x1xf32>, vector<4x1xf32>, vector<4x1xf32> -> vector<4x3xf32>
      %c0_43 = arith.constant 0 : index
      %c0_44 = arith.constant 0 : index
      %c0_45 = arith.constant 0 : index
      %98 = vector.load %arg4[%c0_43, %c0_44, %c0_45] : memref<1x4x3xf32, #tpu.memory_space<vmem>>, vector<1x4x3xf32>
      %99 = vector.shape_cast %98 : vector<1x4x3xf32> to vector<4x3xf32>
      %100 = vector.shape_cast %97 : vector<4x3xf32> to vector<1x4x3xf32>
      tpu.vector_store %arg4[%c0_43, %c0_44, %c0_45], %100 {strides = array<i32>} : memref<1x4x3xf32, #tpu.memory_space<vmem>>, vector<1x4x3xf32>,
    } else {
    }
    return
  }
  func.func @transform_0(%arg0: i32, %arg1: i32) -> (i32, i32, i32, i32) {
    %c0_i32 = arith.constant 0 : i32
    %c0_i32_0 = arith.constant 0 : i32
    %c0_i32_1 = arith.constant 0 : i32
    return %arg0, %c0_i32, %arg1, %c0_i32_0 : i32, i32, i32, i32
  }
  func.func @transform_1(%arg0: i32, %arg1: i32) -> (i32, i32, i32) {
    %c0_i32 = arith.constant 0 : i32
    %c0_i32_0 = arith.constant 0 : i32
    return %arg0, %arg1, %c0_i32 : i32, i32, i32
  }
  func.func @transform_2(%arg0: i32, %arg1: i32) -> (i32, i32, i32) {
    %c0_i32 = arith.constant 0 : i32
    %c0_i32_0 = arith.constant 0 : i32
    %c0_i32_1 = arith.constant 0 : i32
    return %arg0, %c0_i32, %c0_i32_0 : i32, i32, i32
  }
}

</mosaic_0001>

<bundles_post_ra>
// kernel: _dice_loss_impl.1
= control target key start
LH: loop header
LB: loop body
LE: loop exit
PB: predicated region body
PF: predicated region fallthrough
CT: control target
= control target key end

     0   :  { %s556_s9 = smov 0   ;;  %s558_s10 = smov 0   ;;  %s645_s0 = inlined_call_operand.vmem [shape: f32[2,4,2,128], index: 0, kind: input, shape index: {}]   ;;  %s646_s1 = inlined_call_operand.vmem [shape: s32[2,2,128], index: 1, kind: input, shape index: {}]   ;;  %s647_s2 = inlined_call_operand.vmem [shape: f32[2,4,3], index: 2, kind: output, shape index: {}]  }
   0x1   :  { %s560_s11 = smov 0  }
   0x2 LB: > { %s24_s12 = sadd.s32 1, %s534_s10  ;;  %p469_p0 = scmp.ge.s32.totalorder %s538_s11, 1  ;;  %s538_s11 = sphi %s560_s11, %s12_s11   ;;  %s534_s10 = sphi %s558_s10, %s649_s10   ;;  %s530_s9 = sphi %s556_s9, %s648_s9  }
   0x3   : > { %p26_p1 = scmp.ge.s32.totalorder %s24_s12, 2  ;;  %p143_p2 = scmp.lt.s32.totalorder %s538_s11, 3 }
   0x5   : > { %s651_s12 = smov (%p26_p1, %s24_s12), 0  ;;  %p144_p3 = pnand %p469_p0, %p143_p2 }
   0x6   : > { %p174_p4 = scmp.lt.s32.totalorder (!%p144_p3), %s530_s9, 1  ;;  %v540_v0 = vmov (!%p144_p3), 0.0   ;;  %vm205_vm0 = vcmask (!%p144_p3), 1041408   ;;  %vm342_vm5 = vcmask (!%p144_p3), 1040384   ;;  %vm345_vm6 = vcmask (!%p144_p3), 1042432  }
   0x7   : > { %147 = sbr.rel (%p144_p3) target bundleno = 238 (0xee), region = 28  ;;  %197 = vst [vmem:[#allocation2] sm:$0xf] (!%p144_p3), %v540_v0  ;;  %198 = vst [vmem:[#allocation3] sm:$0xf] (!%p144_p3), %v540_v0  ;;  %vm365_vm7 = vcmask (!%p144_p3), 1043456  }
   0x8   : > { %199 = vst [vmem:[#allocation4] sm:$0xf] (!%p144_p3), %v540_v0  ;;  %vm377_vm8 = vcmask (!%p144_p3), 7168   ;;  %vm379_vm9 = vcmask (!%p144_p3), 15360   ;;  %vm381_vm10 = vcmask (!%p144_p3), 19456  }
   0xe   : > { %s653_s9 = smov (!%p174_p4, %s530_s9), 1 }
   0xf   : > { %s480_s13 = sshll.u32 %s653_s9, 3  ;;  %s472_s14 = sshll.u32 %s653_s9, 1  ;;  %v355_v54 = vld [vmem:[#allocation4] sm:$0xf] }
  0x10   : > { %s181_s17 = scalar_lea.vmem %s645_s0, %s480_s13  ;;  %s188_s20 = scalar_lea.vmem %s646_s1, %s472_s14 }
  0x11   : > { %v200_v1 = vld [vmem:[%s181_s17] sm:$0x3]  ;;  %v201_v2 = vld [vmem:[%s181_s17 + $0x2] sm:$0x3]  ;;  %v202_v3 = vld [vmem:[%s181_s17 + $0x4] sm:$0x3] }
  0x12   : > { %v203_v4 = vld [vmem:[%s181_s17 + $0x6] sm:$0x3]  ;;  %v204_v5 = vld [vmem:[%s188_s20] sm:$0x3]  ;;  %v206_v6 = vsel %vm205_vm0, %v200_v1, -inf  ;;  %v207_v7 = vsel %vm205_vm0, %v201_v2, -inf }
  0x13   : > { %v208_v8 = vsel %vm205_vm0, %v202_v3, -inf  ;;  %v209_v9 = vsel %vm205_vm0, %v203_v4, -inf  ;;  %v210_v10 = vmax.f32 %v206_v6, %v207_v7  ;;  %vm237_vm1 = vcmp.eq.s32.totalorder %v204_v5, 1  ;;  %s473_s21 = sshll.u32 %s653_s9, 2 }
  0x14   : > { %v211_v11 = vmax.f32 %v208_v8, %v209_v9  ;;  %v588_v12 = vsel %vm237_vm1, 1.0, %v540_v0  ;;  %vm263_vm2 = vcmp.eq.s32.totalorder %v204_v5, 2  ;;  %vm289_vm3 = vcmp.eq.s32.totalorder %v204_v5, 3  ;;  %s192_s24 = scalar_lea.vmem %s647_s2, %s473_s21 }
  0x15   : > { %v590_v13 = vsel %vm263_vm2, 1.0, %v540_v0  ;;  %v592_v14 = vsel %vm289_vm3, 1.0, %v540_v0  ;;  %vm315_vm4 = vcmp.eq.s32.totalorder %v204_v5, 4  ;;  %v256_v15 = vsel %vm205_vm0, %v588_v12, 0.0 }
  0x16   : > { %v212_v16 = vmax.f32 %v210_v10, %v211_v11  ;;  %v596_v17 = vsel %vm315_vm4, 1.0, %v540_v0  ;;  %v257_v18 = vrot.slane %v256_v15, 4  ;;  %v282_v19 = vsel %vm205_vm0, %v590_v13, 0.0 }
  0x17   : > { %v283_v20 = vrot.slane %v282_v19, 4  ;;  %v308_v21 = vsel %vm205_vm0, %v592_v14, 0.0  ;;  %v334_v22 = vsel %vm205_vm0, %v596_v17, 0.0 }
  0x18   : > { %v213_v23 = vsub.f32 %v200_v1, %v212_v16  ;;  %v214_v24 = vsub.f32 %v201_v2, %v212_v16  ;;  %v215_v25 = vsub.f32 %v202_v3, %v212_v16  ;;  %v216_v26 = vsub.f32 %v203_v4, %v212_v16 }
  0x19   : > { %v258_v27 = vadd.f32 %v257_v18, %v256_v15  ;;  %v284_v28 = vadd.f32 %v283_v20, %v282_v19  ;;  %v309_v29 = vrot.slane %v308_v21, 4  ;;  %v335_v30 = vrot.slane %v334_v22, 4 }
  0x1a   : > { %v217_v31 = vmul.f32 1.442695, %v213_v23  ;;  %v219_v32 = vmul.f32 1.442695, %v214_v24  ;;  %v221_v33 = vmul.f32 1.442695, %v215_v25 }
  0x1b   : > { %v223_v34 = vmul.f32 1.442695, %v216_v26  ;;  %v259_v35 = vrot.slane %v258_v27, 2  ;;  %v285_v36 = vrot.slane %v284_v28, 2  ;;  %v310_v37 = vadd.f32 %v309_v29, %v308_v21 }
  0x1c   : > { %506 = vpow2.f32 %v217_v31  ;;  %v336_v38 = vadd.f32 %v335_v30, %v334_v22 }
  0x1d   : > { %508 = vpow2.f32 %v219_v32  ;;  %v260_v39 = vadd.f32 %v259_v35, %v258_v27  ;;  %v286_v40 = vadd.f32 %v285_v36, %v284_v28  ;;  %v311_v41 = vrot.slane %v310_v37, 2 }
  0x1e   : > { %510 = vpow2.f32 %v221_v33  ;;  %v337_v42 = vrot.slane %v336_v38, 2 }
  0x1f   : > { %512 = vpow2.f32 %v223_v34  ;;  %v261_v43 = vrot.slane %v260_v39, 1  ;;  %v287_v44 = vrot.slane %v286_v40, 1  ;;  %v312_v45 = vadd.f32 %v311_v41, %v310_v37 }
  0x20   : > { %v338_v46 = vadd.f32 %v337_v42, %v336_v38 }
  0x21   : > { %v262_v47 = vadd.f32 %v261_v43, %v260_v39  ;;  %v288_v48 = vadd.f32 %v287_v44, %v286_v40  ;;  %v313_v49 = vrot.slane %v312_v45, 1 }
  0x22   : > { %v339_v50 = vrot.slane %v338_v46, 1 }
  0x23   : > { %v314_v51 = vadd.f32 %v313_v49, %v312_v45  ;;  %v356_v52 = vsel %vm342_vm5, %v262_v47, %v288_v48 }
  0x24   : > { %v340_v53 = vadd.f32 %v339_v50, %v338_v46 }
  0x25   : > { %v357_v55 = vsel %vm205_vm0, %v356_v52, %v314_v51 }
  0x26   : > { %v507_v56 = vpop.eup %506  ;;  %v358_v57 = vsel %vm345_vm6, %v357_v55, %v340_v53 }
  0x27   : > { %v509_v58 = vpop.eup %508  ;;  %v225_v59 = vsel %vm205_vm0, %v507_v56, 0.0  ;;  %v359_v60 = vadd.f32 %v358_v57, %v355_v54 }
  0x28   : > { %v511_v61 = vpop.eup %510  ;;  %v226_v62 = vsel %vm205_vm0, %v509_v58, 0.0 }
  0x29   : > { %v513_v63 = vpop.eup %512  ;;  %v227_v0 = vadd.f32 %v226_v62, %v225_v59  ;;  %v228_v1 = vsel %vm205_vm0, %v511_v61, 0.0  ;;  %360 = vst [vmem:[#allocation4] sm:$0xf] %v359_v60 }
  0x2a   : > { %v230_v2 = vsel %vm205_vm0, %v513_v63, 0.0 }
  0x2b   : > { %v229_v3 = vadd.f32 %v228_v1, %v227_v0 }
  0x2d   : > { %v231_v4 = vadd.f32 %v230_v2, %v229_v3 }
  0x2f   : > { %514 = vrcp.f32 %v231_v4 }
  0x30   : > { %v373_v5 = vld [vmem:[#allocation4] sm:$0xf] }
  0x31   : > { %v374_v6 = vsel %vm365_vm7, %v373_v5, 0.0 }
  0x32   : > { %375 = vadd.xlane.f32.xlu1 %v374_v6 }
  0x39   : > { %v515_v7 = vpop.eup %514 }
  0x3a   : > { %v233_v8 = vmul.f32 %v515_v7, %v507_v56  ;;  %v234_v9 = vmul.f32 %v515_v7, %v509_v58  ;;  %v235_v10 = vmul.f32 %v515_v7, %v511_v61  ;;  %v236_v11 = vmul.f32 %v515_v7, %v513_v63 }
  0x3c   : > { %v240_v15 = vmul.f32 %v588_v12, %v233_v8  ;;  %v266_v16 = vmul.f32 %v590_v13, %v234_v9  ;;  %v292_v18 = vmul.f32 %v592_v14, %v235_v10  ;;  %v318_v19 = vmul.f32 %v596_v17, %v236_v11 }
  0x3d   : > { %v248_v20 = vmul.f32 %v233_v8, %v233_v8  ;;  %v274_v21 = vmul.f32 %v234_v9, %v234_v9  ;;  %v300_v22 = vmul.f32 %v235_v10, %v235_v10  ;;  %v326_v23 = vmul.f32 %v236_v11, %v236_v11  ;;  %v341_v8 = vld [vmem:[#allocation2] sm:$0xf] }
  0x3e   : > { %v241_v24 = vsel %vm205_vm0, %v240_v15, 0.0  ;;  %v267_v25 = vsel %vm205_vm0, %v266_v16, 0.0  ;;  %v293_v26 = vsel %vm205_vm0, %v292_v18, 0.0  ;;  %v319_v27 = vsel %vm205_vm0, %v318_v19, 0.0 }
  0x3f   : > { %v242_v28 = vrot.slane %v241_v24, 4  ;;  %v268_v12 = vrot.slane %v267_v25, 4  ;;  %v294_v29 = vrot.slane %v293_v26, 4  ;;  %v320_v13 = vrot.slane %v319_v27, 4 }
  0x40   : > { %v249_v14 = vsel %vm205_vm0, %v248_v20, 0.0  ;;  %v275_v17 = vsel %vm205_vm0, %v274_v21, 0.0  ;;  %v301_v30 = vsel %vm205_vm0, %v300_v22, 0.0  ;;  %v327_v31 = vsel %vm205_vm0, %v326_v23, 0.0  ;;  %v349_v21 = vld [vmem:[#allocation3] sm:$0xf] }
  0x41   : > { %v243_v32 = vadd.f32 %v242_v28, %v241_v24  ;;  %v269_v33 = vadd.f32 %v268_v12, %v267_v25  ;;  %v295_v34 = vadd.f32 %v294_v29, %v293_v26  ;;  %v321_v35 = vadd.f32 %v320_v13, %v319_v27 }
  0x42   : > { %v250_v36 = vrot.slane %v249_v14, 4  ;;  %v276_v37 = vrot.slane %v275_v17, 4  ;;  %v302_v38 = vrot.slane %v301_v30, 4  ;;  %v328_v39 = vrot.slane %v327_v31, 4 }
  0x43   : > { %v244_v40 = vrot.slane %v243_v32, 2  ;;  %v270_v41 = vrot.slane %v269_v33, 2  ;;  %v296_v42 = vrot.slane %v295_v34, 2  ;;  %v322_v43 = vrot.slane %v321_v35, 2 }
  0x44   : > { %v251_v44 = vadd.f32 %v250_v36, %v249_v14  ;;  %v277_v45 = vadd.f32 %v276_v37, %v275_v17  ;;  %v303_v46 = vadd.f32 %v302_v38, %v301_v30  ;;  %v329_v47 = vadd.f32 %v328_v39, %v327_v31 }
  0x45   : > { %v245_v48 = vadd.f32 %v244_v40, %v243_v32  ;;  %v271_v49 = vadd.f32 %v270_v41, %v269_v33  ;;  %v297_v50 = vadd.f32 %v296_v42, %v295_v34  ;;  %v323_v51 = vadd.f32 %v322_v43, %v321_v35 }
  0x46   : > { %v252_v52 = vrot.slane %v251_v44, 2  ;;  %v278_v53 = vrot.slane %v277_v45, 2  ;;  %v304_v54 = vrot.slane %v303_v46, 2  ;;  %v330_v55 = vrot.slane %v329_v47, 2 }
  0x47   : > { %v246_v56 = vrot.slane %v245_v48, 1  ;;  %v272_v57 = vrot.slane %v271_v49, 1  ;;  %v298_v58 = vrot.slane %v297_v50, 1  ;;  %v324_v59 = vrot.slane %v323_v51, 1 }
  0x48   : > { %v253_v60 = vadd.f32 %v252_v52, %v251_v44  ;;  %v279_v61 = vadd.f32 %v278_v53, %v277_v45  ;;  %v305_v62 = vadd.f32 %v304_v54, %v303_v46  ;;  %v331_v63 = vadd.f32 %v330_v55, %v329_v47 }
  0x49   : > { %v247_v0 = vadd.f32 %v246_v56, %v245_v48  ;;  %v273_v1 = vadd.f32 %v272_v57, %v271_v49  ;;  %v299_v2 = vadd.f32 %v298_v58, %v297_v50  ;;  %v325_v3 = vadd.f32 %v324_v59, %v323_v51 }
  0x4a   : > { %v254_v4 = vrot.slane %v253_v60, 1  ;;  %v280_v5 = vrot.slane %v279_v61, 1  ;;  %v306_v6 = vrot.slane %v305_v62, 1  ;;  %v332_v7 = vrot.slane %v331_v63, 1 }
  0x4b   : > { %v343_v9 = vsel %vm342_vm5, %v247_v0, %v273_v1 }
  0x4c   : > { %v344_v10 = vsel %vm205_vm0, %v343_v9, %v299_v2  ;;  %v255_v11 = vadd.f32 %v254_v4, %v253_v60  ;;  %v281_v15 = vadd.f32 %v280_v5, %v279_v61  ;;  %v307_v16 = vadd.f32 %v306_v6, %v305_v62 }
  0x4d   : > { %v346_v18 = vsel %vm345_vm6, %v344_v10, %v325_v3  ;;  %v333_v19 = vadd.f32 %v332_v7, %v331_v63 }
  0x4e   : > { %v347_v20 = vadd.f32 %v346_v18, %v341_v8  ;;  %v350_v22 = vsel %vm342_vm5, %v255_v11, %v281_v15 }
  0x4f   : > { %v351_v23 = vsel %vm205_vm0, %v350_v22, %v307_v16 }
  0x50   : > { %348 = vst [vmem:[#allocation2] sm:$0xf] %v347_v20  ;;  %v352_v24 = vsel %vm345_vm6, %v351_v23, %v333_v19 }
  0x51   : > { %v353_v25 = vadd.f32 %v352_v24, %v349_v21 }
  0x53   : > { %354 = vst [vmem:[#allocation3] sm:$0xf] %v353_v25 }
  0x57   : > { %v364_v26 = vld [vmem:[#allocation2] sm:$0xf] }
  0x58   : > { %v366_v27 = vsel %vm365_vm7, %v364_v26, 0.0 }
  0x59   : > { %367 = vadd.xlane.f32.xlu0 %v366_v27 }
  0x5a   : > { %v369_v28 = vld [vmem:[#allocation3] sm:$0xf] }
  0x5b   : > { %v370_v12 = vsel %vm365_vm7, %v369_v28, 0.0 }
  0x5d   : > { %371 = vadd.xlane.f32.xlu0 %v370_v12 }
  0xbf   : > { %v376_v13 = vpop.xlane.xlu1 %375 }
  0xe6   : > { %v368_v29 = vpop.xlane.xlu0 %367 }
  0xea   : > { %v372_v14 = vpop.xlane.xlu0 %371 }
  0xeb   : > { %v378_v17 = vsel %vm377_vm8, %v368_v29, %v372_v14 }
  0xec   : > { %v380_v30 = vsel %vm379_vm9, %v378_v17, %v376_v13 }
  0xed   : > { %382 = vst.msk [vmem:[%s192_s24] sm:$0xf] %vm381_vm10, %v380_v30 }
  0xee PF: > { %s12_s11 = sadd.s32 1, %s538_s11   ;;  %s648_s9 = smov %s534_s10 }
  0xef   : > { %p9_p5 = scmp.ge.s32.totalorder %s12_s11, 4   ;;  %s649_s10 = smov %s651_s12 }
  0xf1   :  { %11 = sbr.rel (!%p9_p5) target bundleno = 2 (0x2), region = 69 }

</bundles_post_ra>
